<compile_context>
chip_gen: v6e
topology: v6e:2x2x1
jax: 0.10.0
libtpu: 0.0.40
codegen_flags: <defaults>
</compile_context>

<pallas_src>
import functools

import jax
import jax.numpy as jnp
from jax.experimental import pallas as pl
from jax.experimental.pallas import tpu as pltpu


def _nconv_kernel(at_ref, x_ref, o_ref):
    # at_ref: (W, V)   A transposed, resident across the whole grid
    # x_ref:  (V, TM)  current lane tile of the flattened input
    # o_ref:  (W, TM)  current lane tile of the output
    o_ref[...] = jnp.dot(
        at_ref[...], x_ref[...], preferred_element_type=jnp.float32
    ).astype(o_ref.dtype)


@functools.partial(jax.jit, static_argnames=("tile_m",))
def nconv(x, A, *, tile_m=512):
    """Pallas implementation of einsum('ncvl,vw->ncwl', x, A)."""
    N, C, V, L = x.shape
    V2, W = A.shape
    assert V == V2, "contraction dims must match"

    M = N * C * L

    # ---- layout plumbing (plain JAX glue) --------------------------------
    # x: (N, C, V, L) -> (V, N, C, L) -> (V, M)   with M on the TPU lane axis
    x_vm = jnp.transpose(x, (2, 0, 1, 3)).reshape(V, M)
    at = A.T  # (W, V)

    # Pick a 128-aligned lane tile and zero-pad M so it divides evenly.
    tm = max(128, (min(tile_m, M) + 127) // 128 * 128)
    m_pad = pl.cdiv(M, tm) * tm
    if m_pad != M:
        x_vm = jnp.pad(x_vm, ((0, 0), (0, m_pad - M)))

    grid = (m_pad // tm,)

    out_wm = pl.pallas_call(
        _nconv_kernel,
        out_shape=jax.ShapeDtypeStruct((W, m_pad), x.dtype),
        grid_spec=pltpu.PrefetchScalarGridSpec(
            num_scalar_prefetch=0,
            grid=grid,
            in_specs=[
                # A^T: constant block index -> one DMA, stays resident in VMEM.
                pl.BlockSpec((W, V), lambda m: (0, 0)),
                # x tile: full contraction dim V, TM lanes.
                pl.BlockSpec((V, tm), lambda m: (0, m)),
            ],
            out_specs=pl.BlockSpec((W, tm), lambda m: (0, m)),
        ),
        compiler_params=pltpu.CompilerParams(
            dimension_semantics=("parallel",),
        ),
    )(at, x_vm)

    # ---- undo layout plumbing --------------------------------------------
    # (W, m_pad) -> (W, M) -> (W, N, C, L) -> (N, C, W, L)
    out = out_wm[:, :M].reshape(W, N, C, L)
    return jnp.transpose(out, (1, 2, 0, 3))


if __name__ == "__main__":
    key = jax.random.PRNGKey(0)
    kx, ka = jax.random.split(key)

    # Small shapes consistent with the module: x is (N, C, V, L), A is (V, W).
    N, C, V, L, W = 2, 4, 16, 16, 16
    x = jax.random.normal(kx, (N, C, V, L), dtype=jnp.float32)
    A = jax.random.normal(ka, (V, W), dtype=jnp.float32)

    out = nconv(x, A)
    out = jax.block_until_ready(out)

    ref = jnp.einsum("ncvl,vw->ncwl", x, A)
    assert out.shape == (N, C, W, L)
    assert jnp.allclose(out, ref, atol=1e-4, rtol=1e-4)

    # Second check with non-aligned / non-square shapes (exercises padding).
    N2, C2, V2_, L2, W2 = 2, 3, 20, 13, 24
    kx2, ka2 = jax.random.split(ka)
    x2 = jax.random.normal(kx2, (N2, C2, V2_, L2), dtype=jnp.float32)
    A2 = jax.random.normal(ka2, (V2_, W2), dtype=jnp.float32)
    out2 = jax.block_until_ready(nconv(x2, A2))
    ref2 = jnp.einsum("ncvl,vw->ncwl", x2, A2)
    assert out2.shape == (N2, C2, W2, L2)
    assert jnp.allclose(out2, ref2, atol=1e-4, rtol=1e-4)

    print("KERNEL_OK")
</pallas_src>

<mosaic_0001>
module attributes {stable_mosaic.version = 11 : i64} {
  func.func @_nconv_kernel(%arg0: i32, %arg1: memref<16x16xf32, #tpu.memory_space<vmem>>, %arg2: memref<16x128xf32, #tpu.memory_space<vmem>>, %arg3: memref<16x128xf32, #tpu.memory_space<vmem>>) attributes {dimension_semantics = [#tpu.dimension_semantics<parallel>], iteration_bounds = array<i64: 1>, scalar_prefetch = 0 : i64, scratch_operands = 0 : i64, tpu.core_type = #tpu.core_type<tc>, window_params = [{pipeline_mode = #tpu.pipeline_mode<synchronous>, transform_indices = @transform_0, window_bounds = array<i64: 16, 16>}, {transform_indices = @transform_1, window_bounds = array<i64: 16, 128>}, {transform_indices = @transform_2, window_bounds = array<i64: 16, 128>}]} {
    %c0 = arith.constant 0 : index
    %c0_0 = arith.constant 0 : index
    %0 = vector.load %arg1[%c0, %c0_0] : memref<16x16xf32, #tpu.memory_space<vmem>>, vector<16x16xf32>
    %c0_1 = arith.constant 0 : index
    %c0_2 = arith.constant 0 : index
    %1 = vector.load %arg2[%c0_1, %c0_2] : memref<16x128xf32, #tpu.memory_space<vmem>>, vector<16x128xf32>
    %cst = arith.constant dense<0.000000e+00> : vector<16x128xf32>
    %2 = tpu.matmul %0, %1, %cst {dimension_numbers = #tpu.dot_dimension_numbers<[1], [0], [0], [1], [0, 0, 1, 1], [], []>} : vector<16x16xf32>, vector<16x128xf32>, vector<16x128xf32> -> vector<16x128xf32>
    %c0_3 = arith.constant 0 : index
    %c0_4 = arith.constant 0 : index
    %3 = vector.load %arg3[%c0_3, %c0_4] : memref<16x128xf32, #tpu.memory_space<vmem>>, vector<16x128xf32>
    tpu.vector_store %arg3[%c0_3, %c0_4], %2 {strides = array<i32>} : memref<16x128xf32, #tpu.memory_space<vmem>>, vector<16x128xf32>,
    return
  }
  func.func @transform_0(%arg0: i32) -> (i32, i32) {
    %c0_i32 = arith.constant 0 : i32
    %c0_i32_0 = arith.constant 0 : i32
    %c0_i32_1 = arith.constant 0 : i32
    return %c0_i32, %c0_i32_0 : i32, i32
  }
  func.func @transform_1(%arg0: i32) -> (i32, i32) {
    %c0_i32 = arith.constant 0 : i32
    %c0_i32_0 = arith.constant 0 : i32
    return %c0_i32, %arg0 : i32, i32
  }
  func.func @transform_2(%arg0: i32) -> (i32, i32) {
    %c0_i32 = arith.constant 0 : i32
    %c0_i32_0 = arith.constant 0 : i32
    return %c0_i32, %arg0 : i32, i32
  }
}

</mosaic_0001>

<bundles_post_ra>
// kernel: nconv.1
= control target key start
LH: loop header
LB: loop body
LE: loop exit
PB: predicated region body
PF: predicated region fallthrough
CT: control target
= control target key end

     0   :  { %vm15_vm0 = vcmask 130048   ;;  %s149_s1 = inlined_call_operand.vmem [shape: f32[16,128], index: 1, kind: input, shape index: {}]   ;;  %s150_s0 = inlined_call_operand.vmem [shape: f32[16,16], index: 0, kind: input, shape index: {}]   ;;  %s151_s2 = inlined_call_operand.vmem [shape: f32[16,128], index: 2, kind: output, shape index: {}]  }
   0x1   :  { %v14_v0 = vld [vmem:[%s149_s1 + $0x8] sm:$0xff]  ;;  %v13_v1 = vld [vmem:[%s149_s1] sm:$0xff] }
   0x2   :  { %v11_v2 = vld [vmem:[%s150_s0] sm:$0xff]  ;;  %109 = vmatprep.subr.mxu0 %v14_v0  ;;  %v12_v3 = vld [vmem:[%s150_s0 + $0x8] sm:$0xff] }
   0x3   :  { %113 = vmatprep.mubr.msk.f32.mxu0 %vm15_vm0, %v11_v2  ;;  %110 = vmatpush3.msra.mxu0 %v14_v0 }
   0x4   :  { %111 = vmatprep.subr.mxu0 %v13_v1 }
   0x5   :  { %112 = vmatpush3.msra.mxu0 %v13_v1 }
   0x6   :  { %114 = vmatmul.mubr.msk.f32.vlgmr.msra.gmra.mxu0 %vm15_vm0, %v12_v3 }
  0xc6   :  { %v115_v4 = vpop.f32.mrf.mxu0 }
  0xc7   :  { %98 = vst [vmem:[%s151_s2 + $0x8] sm:$0xff] %v115_v4 }
  0xc8   :  { %v88_v5 = vpop.f32.mrf.mxu0 }
  0xc9   :  { %97 = vst [vmem:[%s151_s2] sm:$0xff] %v88_v5 }

</bundles_post_ra>
